<compile_context>
chip_gen: v7x
topology: tpu7x:2x2x1
jax: 0.10.0
libtpu: 0.0.40
codegen_flags: <defaults>
</compile_context>

<pallas_src>
import math

import jax
import jax.numpy as jnp
from jax.experimental import pallas as pl
from jax.experimental.pallas import tpu as pltpu

LANE = 128


def _round_up(x, m):
    return (x + m - 1) // m * m


# -----------------------------------------------------------------------------
# Generation-aware limits (v5e/v6e: 128 MiB physical VMEM, v7x: 64 MiB).
# -----------------------------------------------------------------------------
def _tpu_limits():
    phys = 64 * 1024 * 1024
    try:
        info = pltpu.get_tpu_info()
        phys = int(getattr(info, "vmem_capacity_bytes", phys) or phys)
    except Exception:
        pass
    budget = min(phys * 3 // 4, 100 * 1024 * 1024)     # headroom under physical
    tm_max = 512 if phys <= 64 * 1024 * 1024 else 2048  # v7x vs v5e/v6e
    return budget, tm_max


_VMEM_BUDGET, _TM_MAX = _tpu_limits()


# -----------------------------------------------------------------------------
# Pallas kernels: fused GEMM + bias (+ fused 1x1-skip / identity residual) + ReLU
# Operands: bf16 patches/weights/residual rows, f32 bias; f32 MXU accumulation;
# lane-dense output tile (tn multiple of 128), stored in o_ref.dtype (bf16/f32).
# -----------------------------------------------------------------------------
def _gemm_bias_relu_kernel(x_ref, w_ref, b_ref, o_ref):
    acc = jnp.dot(x_ref[...], w_ref[...], preferred_element_type=jnp.float32)
    o_ref[...] = jnp.maximum(acc + b_ref[...], 0.0).astype(o_ref.dtype)


def _res_proj_kernel(x_ref, r_ref, w_ref, b_ref, wsk_ref, bsk_ref, o_ref):
    acc = jnp.dot(x_ref[...], w_ref[...], preferred_element_type=jnp.float32)
    skip = jnp.dot(r_ref[...], wsk_ref[...], preferred_element_type=jnp.float32)
    o_ref[...] = jnp.maximum(acc + skip + b_ref[...] + bsk_ref[...],
                             0.0).astype(o_ref.dtype)


def _res_id_kernel(x_ref, r_ref, w_ref, b_ref, o_ref):
    acc = jnp.dot(x_ref[...], w_ref[...], preferred_element_type=jnp.float32)
    o_ref[...] = jnp.maximum(acc + b_ref[...] + r_ref[...].astype(jnp.float32),
                             0.0).astype(o_ref.dtype)


# -----------------------------------------------------------------------------
# Gridded GEMM wrapper: 2-D grid over (M row tiles, N column tiles).
# -----------------------------------------------------------------------------
def _choose_tiles(m, row_bytes, n_pad, out_itemsize, shared_bytes_full):
    # N tile: lane-dense; split only on wide layers.
    if n_pad <= 512:
        tn = n_pad
    elif n_pad % 512 == 0:
        tn = 512
    elif n_pad % 256 == 0:
        tn = 256
    else:
        tn = 128
    # Honest per-step VMEM accounting: row operands, output and the "resident"
    # weight/bias blocks are all assumed double-buffered by the auto-pipeline.
    shared_bytes = shared_bytes_full * tn // n_pad
    per_row = 2 * (row_bytes + tn * out_itemsize)
    avail = max(_VMEM_BUDGET - 2 * shared_bytes, per_row * 16)
    tm_fit = max(16, (avail // per_row) // 16 * 16)
    m16 = _round_up(m, 16)
    # >= 2 M-steps whenever possible so the v7x megacore can split the axis.
    tm_split = _round_up((m16 + 1) // 2, 16) if m16 >= 32 else m16
    tm = max(16, min(_TM_MAX, tm_fit, tm_split))
    return tm, tn


def _pad_rows(a, m_pad):
    if a.shape[0] < m_pad:
        a = jnp.pad(a, ((0, m_pad - a.shape[0]), (0, 0)))
    return a


def _run_gemm(kernel, row_operands, shared_operands, n_pad, flops_k, out_dtype):
    """row_operands: (M, Ki) arrays tiled over M (double-buffered pipeline);
    shared_operands: (Ri, n_pad) arrays tiled over N only.
    Returns (M, n_pad) out_dtype = kernel(row_tiles..., shared_tiles...)."""
    m = row_operands[0].shape[0]
    out_itemsize = jnp.dtype(out_dtype).itemsize
    row_bytes = sum(a.shape[1] * a.dtype.itemsize for a in row_operands)
    shared_bytes_full = sum(a.size * a.dtype.itemsize for a in shared_operands)
    tm, tn = _choose_tiles(m, row_bytes, n_pad, out_itemsize, shared_bytes_full)
    m_pad = _round_up(_round_up(m, 16), tm)
    row_operands = [_pad_rows(a, m_pad) for a in row_operands]
    gm, gn = m_pad // tm, n_pad // tn

    in_specs = []
    for a in row_operands:
        in_specs.append(pl.BlockSpec((tm, a.shape[1]), lambda i, j: (i, 0)))
    for a in shared_operands:
        in_specs.append(pl.BlockSpec((a.shape[0], tn), lambda i, j: (0, j)))

    bytes_accessed = int(
        gn * sum(a.size * a.dtype.itemsize for a in row_operands)
        + gm * shared_bytes_full
        + m_pad * n_pad * out_itemsize)

    out = pl.pallas_call(
        kernel,
        out_shape=jax.ShapeDtypeStruct((m_pad, n_pad), out_dtype),
        grid_spec=pltpu.PrefetchScalarGridSpec(
            num_scalar_prefetch=0,
            grid=(gm, gn),
            in_specs=in_specs,
            out_specs=pl.BlockSpec((tm, tn), lambda i, j: (i, j)),
        ),
        compiler_params=pltpu.CompilerParams(
            dimension_semantics=("parallel", "parallel"),
            vmem_limit_bytes=int(_VMEM_BUDGET),
            # Let XLA fuse the im2col / row-gather producers into the input DMA
            # of the pallas call instead of materializing them in HBM.
            allow_input_fusion=[True] * len(row_operands)
                               + [False] * len(shared_operands),
        ),
        cost_estimate=pl.CostEstimate(
            flops=2 * m_pad * flops_k * n_pad,
            transcendentals=0,
            bytes_accessed=bytes_accessed),
    )(*row_operands, *shared_operands)
    return out[:m]


# -----------------------------------------------------------------------------
# Glue (plain JAX): fused im2col at kept output positions, resize index maps.
# Activations are NDHWC bf16 internally; channels are the lane axis of the GEMM.
# -----------------------------------------------------------------------------
def _positions(in_size, out_size):
    """Conv output positions actually computed, plus a deferred nearest-resize
    map when upsampling (consumed by the NEXT block's im2col gather)."""
    if out_size <= in_size:     # downsample (or identity): only keep survivors
        pos = (jnp.arange(out_size) * in_size // out_size).astype(jnp.int32)
        return pos, out_size, None
    pos = jnp.arange(in_size, dtype=jnp.int32)
    out_map = (jnp.arange(out_size) * in_size // out_size).astype(jnp.int32)
    return pos, in_size, out_map


def _gather_spatial(x, idx):
    x = jnp.take(x, idx, axis=1)
    x = jnp.take(x, idx, axis=2)
    x = jnp.take(x, idx, axis=3)
    return x


def _im2col_fused(x_phys, k, in_size, in_map, pos, k_pad):
    """(M, K_pad) patches of the conceptual 'same'-padded conv input, taken at
    output positions `pos`.  The conceptual conv input of length `in_size` is
    x_phys viewed through `in_map` (fuses any pending nearest upsample from the
    previous layer into this layer's patch gather).  Column order = (c,dz,dy,dx)."""
    n, _, _, _, c = x_phys.shape
    pad = k // 2
    if in_map is None:
        in_map = jnp.arange(in_size, dtype=jnp.int32)
    if pad > 0:
        xp = jnp.pad(x_phys, ((0, 0), (1, 1), (1, 1), (1, 1), (0, 0)))
        gmap = jnp.concatenate([
            jnp.zeros((pad,), jnp.int32),
            in_map.astype(jnp.int32) + 1,
            jnp.zeros((pad,), jnp.int32)])
    else:
        xp = x_phys
        gmap = in_map.astype(jnp.int32)
    cols = []
    for dz in range(k):
        xd = jnp.take(xp, gmap[pos + dz], axis=1)
        for dy in range(k):
            xdh = jnp.take(xd, gmap[pos + dy], axis=2)
            for dx in range(k):
                cols.append(jnp.take(xdh, gmap[pos + dx], axis=3))
    p = jnp.stack(cols, axis=-1)                     # (N, Do, Do, Do, C, k^3)
    d_out = pos.shape[0]
    K = c * k ** 3
    p = p.reshape(n * d_out ** 3, K)
    if k_pad > K:
        p = jnp.pad(p, ((0, 0), (0, k_pad - K)))
    return p


# -----------------------------------------------------------------------------
# Blocks (NDHWC in / NDHWC out; may return a deferred upsample map).
# -----------------------------------------------------------------------------
def conv_block_forward(p, x, in_size, out_size, in_map, out_dtype):
    n = x.shape[0]
    pos, d_out, out_map = _positions(in_size, out_size)
    patches = _im2col_fused(x, p["k"], in_size, in_map, pos,
                            p["K_pad"]).astype(jnp.bfloat16)
    y = _run_gemm(_gemm_bias_relu_kernel, [patches], [p["w"], p["b"]],
                  p["n_pad"], p["K_pad"], out_dtype)
    y = y[:, :p["cout"]].reshape(n, d_out, d_out, d_out, p["cout"])
    return y, out_map


def res_block_forward(p, x, in_size, out_size, in_map, out_dtype):
    n = x.shape[0]
    cin, cout = p["cin"], p["cout"]
    pos, d_out, out_map = _positions(in_size, out_size)
    patches = _im2col_fused(x, p["k"], in_size, in_map, pos,
                            p["K_pad"]).astype(jnp.bfloat16)
    src = pos if in_map is None else in_map[pos]
    rows = _gather_spatial(x, src).reshape(n * d_out ** 3, cin).astype(jnp.bfloat16)
    if "wsk" in p:   # fused 1x1 projection skip (second dot inside the kernel)
        rows = jnp.pad(rows, ((0, 0), (0, p["cin_pad"] - cin)))
        y = _run_gemm(_res_proj_kernel, [patches, rows],
                      [p["w"], p["b"], p["wsk"], p["bsk"]],
                      p["n_pad"], p["K_pad"], out_dtype)
    else:            # identity skip (Cin == Cout), bf16 rows, summed in f32
        rows = jnp.pad(rows, ((0, 0), (0, p["n_pad"] - cin)))
        y = _run_gemm(_res_id_kernel, [patches, rows], [p["w"], p["b"]],
                      p["n_pad"], p["K_pad"], out_dtype)
    y = y[:, :cout].reshape(n, d_out, d_out, d_out, cout)
    return y, out_map


# -----------------------------------------------------------------------------
# Parameter init (deterministic, PyTorch-like uniform fan-in scaling).
# Weights are pre-stored in GEMM layout (K_pad x N_pad, bf16; K_pad/N_pad
# multiples of 128) — no per-forward reshape/transpose.
# -----------------------------------------------------------------------------
def _init_conv3d(key, cin, cout, k):
    kw, kb = jax.random.split(key)
    fan_in = cin * k ** 3
    bound = 1.0 / math.sqrt(fan_in)
    w = jax.random.uniform(kw, (cout, cin, k, k, k), jnp.float32, -bound, bound)
    b = jax.random.uniform(kb, (cout,), jnp.float32, -bound, bound)
    return w, b


def _to_gemm_weights(w, b, k_pad, n_pad):
    cout = w.shape[0]
    K = w.shape[1] * w.shape[2] * w.shape[3] * w.shape[4]
    w2 = jnp.transpose(w.reshape(cout, K))                               # (K, Cout)
    w2 = jnp.pad(w2, ((0, k_pad - K), (0, n_pad - cout))).astype(jnp.bfloat16)
    b2 = jnp.pad(b.reshape(1, cout), ((0, 0), (0, n_pad - cout))).astype(jnp.float32)
    return w2, b2


def _init_block(key, layer, cin, cout):
    k = layer["kernel_size"]
    assert k % 2 == 1, "odd kernel size assumed ('same' padding)"
    K = cin * k ** 3
    k_pad = _round_up(K, LANE)       # lane-dense bf16 lhs, packed rhs sublanes
    n_pad = _round_up(cout, LANE)
    p = {"type": layer["type"], "k": k, "cin": cin, "cout": cout,
         "K_pad": k_pad, "n_pad": n_pad}
    if layer["type"] == "Conv":
        w, b = _init_conv3d(key, cin, cout, k)
        p["w_raw"], p["b_raw"] = w, b
        p["w"], p["b"] = _to_gemm_weights(w, b, k_pad, n_pad)
    else:  # Res
        k1, k2 = jax.random.split(key)
        w, b = _init_conv3d(k1, cin, cout, k)
        p["w_raw"], p["b_raw"] = w, b
        p["w"], p["b"] = _to_gemm_weights(w, b, k_pad, n_pad)
        if cin != cout:
            cin_pad = _round_up(cin, LANE)
            wsk, bsk = _init_conv3d(k2, cin, cout, 1)
            p["cin_pad"] = cin_pad
            p["wsk"], p["bsk"] = _to_gemm_weights(wsk, bsk, cin_pad, n_pad)
    return p


class PallasAutoEncoder:
    """Mirror of the PyTorch AutoEncoder: encoder + Flatten, Unflatten + decoder."""

    def __init__(self, config, key):
        self.config = config
        self.encoder = []   # (layer_cfg, params, in_size, out_size)
        self.decoder = []
        for layer in config:
            key, ke, kd = jax.random.split(key, 3)
            enc_p = _init_block(ke, layer, layer["in_channels"], layer["out_channels"])
            dec_p = _init_block(kd, layer, layer["out_channels"], layer["in_channels"])
            self.encoder.append((layer, enc_p, layer["in_size"], layer["out_size"]))
            self.decoder.insert(0, (layer, dec_p, layer["out_size"], layer["in_size"]))
        self.bottleneck_channels = config[-1]["out_channels"]
        # NB: like the PyTorch spec's nn.Unflatten, assumes config[-1]['out_size'] == 1.

    @staticmethod
    def _apply_block(params, x, in_size, out_size, in_map, out_dtype):
        if params["type"] == "Conv":
            return conv_block_forward(params, x, in_size, out_size, in_map, out_dtype)
        return res_block_forward(params, x, in_size, out_size, in_map, out_dtype)

    def forward(self, x):
        x = jnp.transpose(x, (0, 2, 3, 4, 1)).astype(jnp.bfloat16)  # NCDHW -> NDHWC
        in_map = None
        for _, p, in_size, out_size in self.encoder:
            x, in_map = self._apply_block(p, x, in_size, out_size, in_map, jnp.bfloat16)
        if in_map is not None:                    # only if last encoder block upsamples
            x = _gather_spatial(x, in_map)
            in_map = None
        n = x.shape[0]
        x = x.reshape(n, -1)                                      # nn.Flatten
        x = x.reshape(n, 1, 1, 1, self.bottleneck_channels)       # nn.Unflatten (NDHWC)
        for li, (_, p, in_size, out_size) in enumerate(self.decoder):
            last = li == len(self.decoder) - 1
            x, in_map = self._apply_block(p, x, in_size, out_size, in_map,
                                          jnp.float32 if last else jnp.bfloat16)
        if in_map is not None:    # materialize the deferred final nearest upsample
            x = _gather_spatial(x, in_map)
        return jnp.transpose(x, (0, 4, 1, 2, 3)).astype(jnp.float32)  # NDHWC -> NCDHW


# -----------------------------------------------------------------------------
# Reference (pure JAX conv) for the Pallas im2col-GEMM path.
# -----------------------------------------------------------------------------
def _ref_conv3d_same(x, w, b, relu):
    y = jax.lax.conv_general_dilated(
        x, w, window_strides=(1, 1, 1), padding="SAME",
        dimension_numbers=("NCDHW", "OIDHW", "NCDHW"))
    y = y + b.reshape(1, -1, 1, 1, 1)
    if relu:
        y = jnp.maximum(y, 0.0)
    return y


if __name__ == "__main__":
    config = [
        {"type": "Conv", "kernel_size": 3, "in_channels": 1, "out_channels": 4,
         "in_size": 8, "out_size": 4},
        {"type": "Res", "kernel_size": 3, "in_channels": 4, "out_channels": 8,
         "in_size": 4, "out_size": 1},
    ]

    key = jax.random.PRNGKey(0)
    key, kx, kmodel = jax.random.split(key, 3)
    x = jax.random.normal(kx, (2, 1, 8, 8, 8), jnp.float32)   # NCDHW

    model = PallasAutoEncoder(config, kmodel)

    # --- sanity 1: Pallas im2col-GEMM conv (full resolution) matches lax conv ---
    p0 = model.encoder[0][1]
    x_ndhwc = jnp.transpose(x, (0, 2, 3, 4, 1)).astype(jnp.bfloat16)
    pos_full = jnp.arange(8, dtype=jnp.int32)
    patches = _im2col_fused(x_ndhwc, p0["k"], 8, None, pos_full,
                            p0["K_pad"]).astype(jnp.bfloat16)
    y = _run_gemm(_gemm_bias_relu_kernel, [patches], [p0["w"], p0["b"]],
                  p0["n_pad"], p0["K_pad"], jnp.float32)[:, :p0["cout"]]
    y_pallas = jnp.transpose(y.reshape(2, 8, 8, 8, p0["cout"]), (0, 4, 1, 2, 3))
    y_ref = _ref_conv3d_same(x, p0["w_raw"], p0["b_raw"], relu=True)
    rel_err = jnp.max(jnp.abs(y_pallas - y_ref)) / (jnp.max(jnp.abs(y_ref)) + 1e-6)
    assert float(rel_err) < 2.5e-2, float(rel_err)

    # --- sanity 2: fused downsample == conv -> relu -> nearest resize ---
    y_blk, m_blk = conv_block_forward(p0, x_ndhwc, 8, 4, None, jnp.float32)
    assert m_blk is None
    ds_idx = (jnp.arange(4) * 8 // 4).astype(jnp.int32)
    y_ref_ds = _gather_spatial(jnp.transpose(y_ref, (0, 2, 3, 4, 1)), ds_idx)
    rel_err2 = (jnp.max(jnp.abs(y_blk - y_ref_ds)) /
                (jnp.max(jnp.abs(y_ref_ds)) + 1e-6))
    assert float(rel_err2) < 2.5e-2, float(rel_err2)

    # --- sanity 3: fused (deferred) decoder upsample == explicit materialization ---
    pd0 = model.decoder[0][1]
    pd1 = model.decoder[1][1]
    xb = jax.random.normal(key, (2, 1, 1, 1, pd0["cin"]), jnp.float32).astype(jnp.bfloat16)
    y0, map0 = model._apply_block(pd0, xb, model.decoder[0][2], model.decoder[0][3],
                                  None, jnp.bfloat16)
    assert map0 is not None
    y0_mat = _gather_spatial(y0, map0)
    y1_fused, _ = model._apply_block(pd1, y0, model.decoder[1][2],
                                     model.decoder[1][3], map0, jnp.float32)
    y1_mat, _ = model._apply_block(pd1, y0_mat, model.decoder[1][2],
                                   model.decoder[1][3], None, jnp.float32)
    assert float(jnp.max(jnp.abs(y1_fused - y1_mat))) < 1e-5

    # --- full forward ---
    out = jax.block_until_ready(model.forward(x))
    assert out.shape == x.shape, (out.shape, x.shape)
    assert out.dtype == jnp.float32

    # MSE loss equivalent of get_loss
    loss = jnp.mean((out - x) ** 2)
    jax.block_until_ready(loss)

    print("KERNEL_OK")
</pallas_src>

<mosaic_0001>
module attributes {stable_mosaic.version = 11 : i64} {
  func.func @_gemm_bias_relu_kernel(%arg0: i32, %arg1: i32, %arg2: memref<512x128xbf16, #tpu.memory_space<vmem>>, %arg3: memref<128x128xbf16, #tpu.memory_space<vmem>>, %arg4: memref<1x128xf32, #tpu.memory_space<vmem>>, %arg5: memref<512x128xf32, #tpu.memory_space<vmem>>) attributes {dimension_semantics = [#tpu.dimension_semantics<parallel>, #tpu.dimension_semantics<parallel>], iteration_bounds = array<i64: 2, 1>, scalar_prefetch = 0 : i64, scratch_operands = 0 : i64, tpu.core_type = #tpu.core_type<tc>, window_params = [{transform_indices = @transform_0, window_bounds = array<i64: 512, 128>}, {transform_indices = @transform_1, window_bounds = array<i64: 128, 128>}, {transform_indices = @transform_2, window_bounds = array<i64: 1, 128>}, {transform_indices = @transform_3, window_bounds = array<i64: 512, 128>}]} {
    %c0 = arith.constant 0 : index
    %c0_0 = arith.constant 0 : index
    %0 = vector.load %arg2[%c0, %c0_0] : memref<512x128xbf16, #tpu.memory_space<vmem>>, vector<512x128xbf16>
    %c0_1 = arith.constant 0 : index
    %c0_2 = arith.constant 0 : index
    %1 = vector.load %arg3[%c0_1, %c0_2] : memref<128x128xbf16, #tpu.memory_space<vmem>>, vector<128x128xbf16>
    %cst = arith.constant dense<0.000000e+00> : vector<512x128xf32>
    %2 = tpu.matmul %0, %1, %cst {dimension_numbers = #tpu.dot_dimension_numbers<[1], [0], [0], [1], [0, 0, 1, 1], [], []>} : vector<512x128xbf16>, vector<128x128xbf16>, vector<512x128xf32> -> vector<512x128xf32>
    %c0_3 = arith.constant 0 : index
    %c0_4 = arith.constant 0 : index
    %3 = vector.load %arg4[%c0_3, %c0_4] : memref<1x128xf32, #tpu.memory_space<vmem>>, vector<1x128xf32>
    %4 = vector.broadcast %3 : vector<1x128xf32> to vector<512x128xf32>
    %5 = arith.addf %2, %4 : vector<512x128xf32>
    %cst_5 = arith.constant 0.000000e+00 : f32
    %6 = vector.broadcast %cst_5 : f32 to vector<512x128xf32>
    %7 = arith.maximumf %5, %6 : vector<512x128xf32>
    %c0_6 = arith.constant 0 : index
    %c0_7 = arith.constant 0 : index
    %8 = vector.load %arg5[%c0_6, %c0_7] : memref<512x128xf32, #tpu.memory_space<vmem>>, vector<512x128xf32>
    tpu.vector_store %arg5[%c0_6, %c0_7], %7 {strides = array<i32>} : memref<512x128xf32, #tpu.memory_space<vmem>>, vector<512x128xf32>,
    return
  }
  func.func @transform_0(%arg0: i32, %arg1: i32) -> (i32, i32) {
    %c0_i32 = arith.constant 0 : i32
    %c0_i32_0 = arith.constant 0 : i32
    return %arg0, %c0_i32 : i32, i32
  }
  func.func @transform_1(%arg0: i32, %arg1: i32) -> (i32, i32) {
    %c0_i32 = arith.constant 0 : i32
    %c0_i32_0 = arith.constant 0 : i32
    return %c0_i32, %arg1 : i32, i32
  }
  func.func @transform_2(%arg0: i32, %arg1: i32) -> (i32, i32) {
    %c0_i32 = arith.constant 0 : i32
    %c0_i32_0 = arith.constant 0 : i32
    return %c0_i32, %arg1 : i32, i32
  }
  func.func @transform_3(%arg0: i32, %arg1: i32) -> (i32, i32) {
    %c0_i32 = arith.constant 0 : i32
    return %arg0, %arg1 : i32, i32
  }
}

</mosaic_0001>

<bundles_post_ra>
// kernel: tpu_custom_call.1
= control target key start
LH: loop header
LB: loop body
LE: loop exit
PB: predicated region body
PF: predicated region fallthrough
CT: control target
= control target key end

     0   :  { %8 = vsyncpa [#allocation3], 0  ;;  %s1991_s0 = inlined_call_operand.hbm [shape: bf16[1024,128], index: 0, kind: input, shape index: {}]   ;;  %s1992_s1 = inlined_call_operand.hbm [shape: bf16[128,128], index: 1, kind: input, shape index: {}]   ;;  %s1993_s2 = inlined_call_operand.vmem [shape: f32[1,128], index: 2, kind: input, shape index: {}]   ;;  %s1994_s3 = inlined_call_operand.hbm [shape: f32[1024,128], index: 3, kind: output, shape index: {}]  }
   0x1   :  { %10 = vsyncpa [#allocation3 + $0x1], 0 }
   0x2   :  { %11 = vsyncpa [#allocation6], 0 }
   0x3   :  { %12 = vsyncpa [#allocation4], 0 }
   0x4   :  { %14 = vsyncpa [#allocation4 + $0x1], 0  ;;  %s1595_s12 = smov 0   ;;  %s1597_s13 = smov 0  }
   0x5   :  { %s1599_s14 = smov 0   ;;  %s1601_s15 = smov 0  }
   0x6   :  { %s1603_s16 = smov 0   ;;  %s1605_s17 = smov 0  }
   0x7 LB: > { %s1108_s18 = sadd.s32 4294967295, %s1566_s17   ;;  %s1109_s19 = sadd.s32 4294967294, %s1566_s17   ;;  %s1566_s17 = sphi %s1605_s17, %s20_s17   ;;  %s1562_s16 = sphi %s1603_s16, %s2018_s16   ;;  %s1558_s15 = sphi %s1601_s15, %s2017_s15   ;;  %s1554_s14 = sphi %s1599_s14, %s2016_s14   ;;  %s1550_s13 = sphi %s1597_s13, %s2015_s13   ;;  %s1546_s12 = sphi %s1595_s12, %s2014_s12  }
   0x8   : > { %p52_p0 = scmp.ne.s32.totalorder %s1550_s13, %s1546_s12  ;;  %p1629_p1 = scmp.eq.s32.totalorder %s1108_s18, 0 }
   0x9   : > { %p1633_p2 = scmp.eq.s32.totalorder %s1108_s18, 1  ;;  %p136_p3 = scmp.eq.s32.totalorder %s1109_s19, 1 }
   0xa   : > { %s1999_s20 = scalar_select %p1629_p1, 1, 0 }
   0xb   : > { %s2000_s21 = scalar_select %p1633_p2, 1, 0 }
   0xc   : > { %p1639_p4 = por %p1629_p1, %p52_p0  ;;  %p1110_p5 = scmp.ge.s32.totalorder %s1566_s17, 1 }
   0xd   : > { %p1644_p6 = por %p136_p3, %p52_p0  ;;  %p143_p7 = scmp.lt.s32.totalorder %s1566_s17, 3 }
   0xe   : > { %s2001_s22 = scalar_select %p1639_p4, 1, 0 }
   0xf   : > { %s2002_s23 = scalar_select %p1644_p6, 1, 0 }
  0x10   : > { %p1649_p8 = pnand %p1110_p5, %p143_p7  ;;  %s1568_s25 = smov [#allocation5]  }
  0x11   : > { %s157_s26 = sshll.u32 %s1568_s25, 4  ;;  %s32_s28 = sadd.s32 1, %s1562_s16  ;;  %s158_s26 = int_to_ptr.vmem [resolvable:$true] %s157_s26 }
  0x12   : > { %s2003_s24 = scalar_select %p1649_p8, 1, 0 }
  0x13   : > { %p1313_p9 = pneg %p1649_p8  ;;  %s1422_s4 = scalar_lea.hbm %s1992_s1, 1024 }
  0x14   : > { %p1423_p12 = scmp.ne.s32.totalorder %s1992_s1, %s1422_s4  ;;  %p1429_p5 = scmp.lt.u32.totalorder %s1422_s4, %s1992_s1 }
  0x15   : > { %p1658_p11 = pnand %p1313_p9, %p1629_p1 }
  0x17   : > { %p1424_p13 = pneg %p1658_p11 }
  0x19   : > { %p1425_p0 = pnand %p1424_p13, %p1423_p12 }
  0x1b   : > { %p1426_p3 = pneg %p1425_p0 }
  0x1d   : > { %p1431_p7 = pnand %p1429_p5, %p1426_p3 }
  0x1f   : > { %1434 = shalt.err (!%p1431_p7)
}
  0x20   : > { %s1435_s9 = scalar_lea.vmem %s158_s26, 1024  ;;  %p1443_p1 = scmp.lt.s32.totalorder %s158_s26, %s158_s26 }
  0x21   : > { %p1436_p9 = scmp.ne.s32.totalorder %s158_s26, %s1435_s9  ;;  %p1444_p4 = scmp.lt.s32.totalorder %s1435_s9, %s1435_s9 }
  0x23   : > { %p1438_p10 = pnand %p1436_p9, %p1424_p13  ;;  %p1445_p8 = por %p1444_p4, %p1443_p1 }
  0x25   : > { %p1439_p6 = pneg %p1438_p10 }
  0x27   : > { %p1446_p2 = pnand %p1445_p8, %p1439_p6 }
  0x29   : > { %1449 = shalt.err (!%p1446_p2)
}
  0x2a   : > { %s1569_s10 = smov 64   ;;  %s1570_s11 = smov 4  }
  0x2b   : > { %1316 = dma.hbm_to_vmem [thread:$0]  (!%p1658_p11), %s1992_s1, 1024, %s158_s26, [#allocation6], %s1569_s10, %s1569_s10, %s1570_s11  }
  0x2c   : > { %p34_p1 = scmp.ge.s32.totalorder %s32_s28, 2  ;;  %s39_s25 = sadd.s32 1, %s1554_s14 }
  0x2d   : > { %p46_p2 = scmp.ne.s32.totalorder %s1554_s14, %s1550_s13  ;;  %p47_p4 = scmp.eq.s32.totalorder %s1566_s17, 0 }
  0x2e   : > { %s2020_s28 = smov (%p34_p1, %s32_s28), 0  ;;  %p2006_p8 = scmp.ne.s32.totalorder %s2000_s21, 0 }
  0x2f   : > { %p1688_p6 = por %p47_p4, %p46_p2  ;;  %s36_s30 = ssub.s32 %s1562_s16, %s2020_s28 }
  0x30   : > { %p1694_p10 = por %p2006_p8, %p46_p2  ;;  %p1326_p12 = scmp.lt.s32.totalorder %s1566_s17, 2 }
  0x31   : > { %p37_p11 = scmp.eq.s32.totalorder %s36_s30, 0  ;;  %s177_s26 = sand.u32 1, %s1554_s14  }
  0x32   : > { %s1114_s4 = sshll.u32 %s177_s26, 8  ;;  %s1167_s6 = sshll.u32 %s1562_s16, 12 }
  0x33   : > { %s1703_s5 = scalar_select %p37_p11, %s1554_s14, %s39_s25  }
  0x34   : > { %s1709_s9 = scalar_lea.hbm %s1991_s0, %s1167_s6  ;;  %s181_s21 = scalar_lea.vmem [#allocation2], %s1114_s4 }
  0x35   : > { %s188_s18 = sshll.u32 %s181_s21, 4  ;;  %p1715_p13 = pnand %p1326_p12, %p1688_p6  ;;  %s1711_s18 = int_to_ptr.vmem [resolvable:$true] %s188_s18 }
  0x36   : > { %s1719_s25 = scalar_lea.sflag [#allocation3], %s177_s26  ;;  %s1450_s30 = scalar_lea.hbm %s1709_s9, 4096 }
  0x37   : > { %p1451_p0 = scmp.ne.s32.totalorder %s1709_s9, %s1450_s30  ;;  %p1452_p3 = pneg %p1715_p13 }
  0x38   : > { %s1455_s29 = scalar_lea.hbm %s1991_s0, 8192  ;;  %p1456_p9 = scmp.lt.u32.totalorder %s1709_s9, %s1991_s0 }
  0x39   : > { %p1453_p5 = pnand %p1452_p3, %p1451_p0  ;;  %p1457_p1 = scmp.lt.u32.totalorder %s1455_s29, %s1450_s30 }
  0x3a   : > { %p1459_p4 = scmp.lt.u32.totalorder %s1450_s30, %s1709_s9 }
  0x3b   : > { %p1454_p7 = pneg %p1453_p5  ;;  %p1458_p2 = por %p1457_p1, %p1456_p9 }
  0x3d   : > { %p1460_p6 = por %p1459_p4, %p1458_p2 }
  0x3f   : > { %p1461_p8 = pnand %p1460_p6, %p1454_p7 }
  0x41   : > { %1464 = shalt.err (!%p1461_p8)
}
  0x42   : > { %s1465_s26 = scalar_lea.vmem %s1711_s18, 4096  ;;  %s1571_s21 = smov [#allocation2]  }
  0x43   : > { %p1466_p12 = scmp.ne.s32.totalorder %s1711_s18, %s1465_s26  ;;  %s1470_s4 = sshll.u32 %s1571_s21, 4  ;;  %s1471_s4 = int_to_ptr.vmem [resolvable:$false] %s1470_s4 }
  0x44   : > { %s1472_s6 = scalar_lea.vmem %s1471_s4, 8192  ;;  %p1473_p5 = scmp.lt.s32.totalorder %s1711_s18, %s1471_s4 }
  0x45   : > { %p1468_p11 = pnand %p1466_p12, %p1452_p3  ;;  %p1474_p9 = scmp.lt.s32.totalorder %s1472_s6, %s1465_s26 }
  0x47   : > { %p1469_p0 = pneg %p1468_p11  ;;  %p1475_p1 = por %p1474_p9, %p1473_p5 }
  0x49   : > { %p1476_p2 = pnand %p1475_p1, %p1469_p0 }
  0x4b   : > { %1479 = shalt.err (!%p1476_p2)
}
  0x4c   : > { %1320 = dma.hbm_to_vmem [thread:$0]  (!%p1715_p13), %s1709_s9, 4096, %s1711_s18, %s1719_s25, %s1569_s10, %s1569_s10, %s1570_s11  }
  0x4d   : > { %p2009_p3 = scmp.ne.s32.totalorder %s2003_s24, 0 }
  0x4e   : > { %s1753_s30 = sand.u32 (!%p2009_p3), 1, %s1550_s13   ;;  %p2010_p7 = scmp.ne.s32.totalorder (!%p2009_p3), %s2001_s22, 0 }
  0x4f   : > { %200 = sbr.rel (%p2009_p3) target bundleno = 413 (0x19d), region = 32  ;;  %s1118_s29 = sshll.u32 (!%p2009_p3), %s1753_s30, 8 }
  0x50   : > { %s203_s7 = scalar_lea.sflag (!%p2009_p3), [#allocation3], %s1753_s30  ;;  %s1757_s8 = scalar_lea.vmem (!%p2009_p3), [#allocation2], %s1118_s29 }
  0x56   : > { %1533 = dma.done.wait (%p2010_p7), %s203_s7, 4096  }
  0x57   : > { %1535 = vsyncadd (%p2010_p7), %s203_s7, 4294963200  ;;  %p2011_p13 = scmp.ne.s32.totalorder %s1999_s20, 0 }
  0x59   : > { %1537 = dma.done.wait (%p2011_p13), [#allocation6], 1024  }
  0x5a   : > { %1539 = vsyncadd (%p2011_p13), [#allocation6], 4294966272  ;;  %v1382_v0 = vld [vmem:[#allocation5] sm:$0xff]   ;;  %v1383_v1 = vld [vmem:[#allocation5 + $0x8] sm:$0xff]   ;;  %s1120_s24 = sshll.u32 %s1753_s30, 9  ;;  %s1168_s11 = sshll.u32 %s1558_s15, 13 }
  0x5b   : > { %1209 = vmatprep.subr.bf16.mxu0 %v1382_v0  ;;  %1289 = vmatprep.subr.bf16.mxu1 %v1382_v0  ;;  %v1384_v2 = vld [vmem:[#allocation5 + $0x10] sm:$0xff]   ;;  %v1385_v3 = vld [vmem:[#allocation5 + $0x18] sm:$0xff]   ;;  %v1390_v4 = vld [vmem:[%s1757_s8] sm:$0xff]   ;;  %s1813_s10 = scalar_lea.vmem [#allocation7], %s1120_s24  ;;  %s1934_s19 = scalar_lea.hbm %s1994_s3, %s1168_s11 }
  0x5c   : > { %1210 = vmatpush3.bf16.msra.mxu0 %v1382_v0  ;;  %1297 = vmatpush3.bf16.msra.mxu1 %v1382_v0  ;;  %v1391_v5 = vld [vmem:[%s1757_s8 + $0x80] sm:$0xff]   ;;  %v1387_v7 = vld [vmem:[#allocation5 + $0x28] sm:$0xff]   ;;  %v1388_v8 = vld [vmem:[#allocation5 + $0x30] sm:$0xff]   ;;  %s1001_s9 = sshll.u32 %s1813_s10, 4  ;;  %s987_s25 = scalar_lea.sflag [#allocation4], %s1753_s30  ;;  %s1936_s9 = int_to_ptr.vmem [resolvable:$true] %s1001_s9 }
  0x5d   : > { %1211 = vmatprep.subr.bf16.mxu0 %v1383_v1  ;;  %1290 = vmatprep.subr.bf16.mxu1 %v1383_v1  ;;  %v1386_v6 = vld [vmem:[#allocation5 + $0x20] sm:$0xff]   ;;  %v1389_v9 = vld [vmem:[#allocation5 + $0x38] sm:$0xff]   ;;  %v1392_v10 = vld [vmem:[%s1757_s8 + $0x8] sm:$0xff]   ;;  %s1480_s26 = scalar_lea.vmem %s1936_s9, 8192  ;;  %s1572_s21 = smov [#allocation7]  }
  0x5e   : > { %1225 = vmatprep.mubr.bf16.mxu0 %v1390_v4  ;;  %1257 = vmatprep.mubr.bf16.mxu1 %v1391_v5  ;;  %v1393_v11 = vld [vmem:[%s1757_s8 + $0x88] sm:$0xff]   ;;  %v1394_v12 = vld [vmem:[%s1757_s8 + $0x10] sm:$0xff]   ;;  %v1396_v14 = vld [vmem:[%s1757_s8 + $0x18] sm:$0xff]   ;;  %p1481_p4 = scmp.ne.s32.totalorder %s1936_s9, %s1480_s26  ;;  %s1484_s4 = sshll.u32 %s1572_s21, 4  ;;  %s1485_s4 = int_to_ptr.vmem [resolvable:$false] %s1484_s4 }
  0x5f   : > { %v1395_v13 = vld [vmem:[%s1757_s8 + $0x90] sm:$0xff]   ;;  %v1397_v15 = vld [vmem:[%s1757_s8 + $0x98] sm:$0xff]   ;;  %v1398_v16 = vld [vmem:[%s1757_s8 + $0x20] sm:$0xff]   ;;  %s1486_s6 = scalar_lea.vmem %s1485_s4, 16384  ;;  %p1487_p12 = scmp.lt.s32.totalorder %s1936_s9, %s1485_s4 }
  0x60   : > { %1212 = vmatpush3.bf16.msra.mxu0 %v1383_v1  ;;  %1298 = vmatpush3.bf16.msra.mxu1 %v1383_v1  ;;  %v1399_v17 = vld [vmem:[%s1757_s8 + $0xa0] sm:$0xff]   ;;  %v1400_v18 = vld [vmem:[%s1757_s8 + $0x28] sm:$0xff]   ;;  %v1402_v20 = vld [vmem:[%s1757_s8 + $0x30] sm:$0xff]   ;;  %p1482_p6 = pnand %p1481_p4, %p1694_p10  ;;  %p1488_p11 = scmp.lt.s32.totalorder %s1486_s6, %s1480_s26 }
  0x61   : > { %1213 = vmatprep.subr.bf16.mxu0 %v1384_v2  ;;  %1291 = vmatprep.subr.bf16.mxu1 %v1384_v2  ;;  %v1401_v19 = vld [vmem:[%s1757_s8 + $0xa8] sm:$0xff]   ;;  %v1403_v21 = vld [vmem:[%s1757_s8 + $0xb0] sm:$0xff]   ;;  %v1404_v22 = vld [vmem:[%s1757_s8 + $0x38] sm:$0xff]  }
  0x62   : > { %v1405_v23 = vld [vmem:[%s1757_s8 + $0xb8] sm:$0xff]   ;;  %v1406_v24 = vld [vmem:[%s1757_s8 + $0x40] sm:$0xff]   ;;  %v1408_v26 = vld [vmem:[%s1757_s8 + $0x48] sm:$0xff]   ;;  %p1483_p8 = pneg %p1482_p6  ;;  %p1489_p0 = por %p1488_p11, %p1487_p12 }
  0x63   : > { %v1407_v25 = vld [vmem:[%s1757_s8 + $0xc0] sm:$0xff]   ;;  %v1409_v27 = vld [vmem:[%s1757_s8 + $0xc8] sm:$0xff]   ;;  %v1410_v28 = vld [vmem:[%s1757_s8 + $0x50] sm:$0xff]  }
  0x64   : > { %1214 = vmatpush3.bf16.msra.mxu0 %v1384_v2  ;;  %1299 = vmatpush3.bf16.msra.mxu1 %v1384_v2  ;;  %v1411_v29 = vld [vmem:[%s1757_s8 + $0xd0] sm:$0xff]   ;;  %v1412_v30 = vld [vmem:[%s1757_s8 + $0x58] sm:$0xff]   ;;  %v1414_v32 = vld [vmem:[%s1757_s8 + $0x60] sm:$0xff]   ;;  %p1490_p5 = pnand %p1489_p0, %p1483_p8 }
  0x65   : > { %1215 = vmatprep.subr.bf16.mxu0 %v1385_v3  ;;  %1292 = vmatprep.subr.bf16.mxu1 %v1385_v3  ;;  %v1413_v31 = vld [vmem:[%s1757_s8 + $0xd8] sm:$0xff]   ;;  %v1415_v33 = vld [vmem:[%s1757_s8 + $0xe0] sm:$0xff]   ;;  %v1416_v34 = vld [vmem:[%s1757_s8 + $0x68] sm:$0xff]  }
  0x66   : > { %v1417_v35 = vld [vmem:[%s1757_s8 + $0xe8] sm:$0xff]   ;;  %v1418_v36 = vld [vmem:[%s1757_s8 + $0x70] sm:$0xff]   ;;  %v1420_v38 = vld [vmem:[%s1757_s8 + $0x78] sm:$0xff]  }
  0x67   : > { %v1419_v37 = vld [vmem:[%s1757_s8 + $0xf0] sm:$0xff]   ;;  %v1421_v39 = vld [vmem:[%s1757_s8 + $0xf8] sm:$0xff]   ;;  %v1802_v40 = vld [vmem:[%s1993_s2] ss:$0 sm:$0xff] }
  0x68   : > { %1216 = vmatpush3.bf16.msra.mxu0 %v1385_v3  ;;  %1300 = vmatpush3.bf16.msra.mxu1 %v1385_v3 }
  0x69   : > { %1217 = vmatprep.subr.bf16.mxu0 %v1386_v6  ;;  %1293 = vmatprep.subr.bf16.mxu1 %v1386_v6 }
  0x6c   : > { %1218 = vmatpush3.bf16.msra.mxu0 %v1386_v6  ;;  %1301 = vmatpush3.bf16.msra.mxu1 %v1386_v6 }
  0x6d   : > { %1219 = vmatprep.subr.bf16.mxu0 %v1387_v7  ;;  %1294 = vmatprep.subr.bf16.mxu1 %v1387_v7 }
  0x70   : > { %1220 = vmatpush3.bf16.msra.mxu0 %v1387_v7  ;;  %1302 = vmatpush3.bf16.msra.mxu1 %v1387_v7 }
  0x71   : > { %1221 = vmatprep.subr.bf16.mxu0 %v1388_v8  ;;  %1295 = vmatprep.subr.bf16.mxu1 %v1388_v8 }
  0x74   : > { %1222 = vmatpush3.bf16.msra.mxu0 %v1388_v8  ;;  %1303 = vmatpush3.bf16.msra.mxu1 %v1388_v8 }
  0x75   : > { %1223 = vmatprep.subr.bf16.mxu0 %v1389_v9  ;;  %1296 = vmatprep.subr.bf16.mxu1 %v1389_v9 }
  0x78   : > { %1224 = vmatpush3.bf16.msra.mxu0 %v1389_v9  ;;  %1304 = vmatpush3.bf16.msra.mxu1 %v1389_v9 }
  0x7b   : > { %1226 = vmatmul.mubr.bf16.vlgmr.msra.gmra.mrb[0].mxu0 %v1392_v10  ;;  %1258 = vmatmul.mubr.bf16.vlgmr.msra.gmra.mrb[0].mxu1 %v1393_v11 }
  0x7c   : > { %1229 = vmatprep.mubr.bf16.mxu0 %v1394_v12  ;;  %1261 = vmatprep.mubr.bf16.mxu1 %v1395_v13 }
  0x83   : > { %1230 = vmatmul.mubr.bf16.gmra.mrb[4].mxu0 %v1396_v14  ;;  %1262 = vmatmul.mubr.bf16.gmra.mrb[4].mxu1 %v1397_v15 }
  0x84   : > { %1233 = vmatprep.mubr.bf16.mxu0 %v1398_v16  ;;  %1265 = vmatprep.mubr.bf16.mxu1 %v1399_v17 }
  0x8b   : > { %1234 = vmatmul.mubr.bf16.gmra.mrb[8].mxu0 %v1400_v18  ;;  %1266 = vmatmul.mubr.bf16.gmra.mrb[8].mxu1 %v1401_v19 }
  0x8c   : > { %1237 = vmatprep.mubr.bf16.mxu0 %v1402_v20  ;;  %1269 = vmatprep.mubr.bf16.mxu1 %v1403_v21 }
  0x93   : > { %1238 = vmatmul.mubr.bf16.gmra.mrb[12].mxu0 %v1404_v22  ;;  %1270 = vmatmul.mubr.bf16.gmra.mrb[12].mxu1 %v1405_v23 }
  0x94   : > { %1241 = vmatprep.mubr.bf16.mxu0 %v1406_v24  ;;  %1273 = vmatprep.mubr.bf16.mxu1 %v1407_v25 }
  0x9b   : > { %1242 = vmatmul.mubr.bf16.gmra.mrb[16].mxu0 %v1408_v26  ;;  %1274 = vmatmul.mubr.bf16.gmra.mrb[16].mxu1 %v1409_v27 }
  0x9c   : > { %1245 = vmatprep.mubr.bf16.mxu0 %v1410_v28  ;;  %1277 = vmatprep.mubr.bf16.mxu1 %v1411_v29 }
  0xa3   : > { %1246 = vmatmul.mubr.bf16.gmra.mrb[20].mxu0 %v1412_v30  ;;  %1278 = vmatmul.mubr.bf16.gmra.mrb[20].mxu1 %v1413_v31 }
  0xa4   : > { %1249 = vmatprep.mubr.bf16.mxu0 %v1414_v32  ;;  %1281 = vmatprep.mubr.bf16.mxu1 %v1415_v33 }
  0xab   : > { %1250 = vmatmul.mubr.bf16.gmra.mrb[24].mxu0 %v1416_v34  ;;  %1282 = vmatmul.mubr.bf16.gmra.mrb[24].mxu1 %v1417_v35 }
  0xac   : > { %1253 = vmatprep.mubr.bf16.mxu0 %v1418_v36  ;;  %1285 = vmatprep.mubr.bf16.mxu1 %v1419_v37 }
  0xb3   : > { %1254 = vmatmul.mubr.bf16.gmra.mrb[28].mxu0 %v1420_v38  ;;  %1286 = vmatmul.mubr.bf16.gmra.mrb[28].mxu1 %v1421_v39 }
 0x14e   : > { %v1227_v41 = vpop.f32.mrb[0].mxu0  ;;  %v1259_v42 = vpop.f32.mrb[0].mxu1 }
 0x14f   : > { %v612_v43 = vadd.f32 %v1227_v41, %v1802_v40  ;;  %v740_v44 = vadd.f32 %v1259_v42, %v1802_v40  ;;  %v603_v45 = vpop.f32.mrb[1].mxu0  ;;  %v731_v46 = vpop.f32.mrb[1].mxu1 }
 0x150   : > { %v604_v47 = vadd.f32 %v1802_v40, %v603_v45  ;;  %v732_v48 = vadd.f32 %v1802_v40, %v731_v46  ;;  %v1228_v49 = vpop.f32.mrb[2].mxu0  ;;  %v1260_v50 = vpop.f32.mrb[2].mxu1 }
 0x151   : > { %v860_v51 = vmax.f32 %v612_v43, 0.0  ;;  %v892_v52 = vmax.f32 %v740_v44, 0.0  ;;  %v615_v53 = vadd.f32 %v1228_v49, %v1802_v40  ;;  %v743_v54 = vadd.f32 %v1260_v50, %v1802_v40  ;;  %v606_v55 = vpop.f32.mrb[3].mxu0  ;;  %v734_v56 = vpop.f32.mrb[3].mxu1 }
 0x152   : > { %v858_v57 = vmax.f32 %v604_v47, 0.0  ;;  %v890_v58 = vmax.f32 %v732_v48, 0.0  ;;  %v607_v59 = vadd.f32 %v1802_v40, %v606_v55  ;;  %v735_v60 = vadd.f32 %v1802_v40, %v734_v56 }
 0x153   : > { %924 = vst [vmem:[%s1813_s10 + $0x10] sm:$0xff] %v860_v51  ;;  %956 = vst [vmem:[%s1813_s10 + $0x110] sm:$0xff] %v892_v52  ;;  %v861_v61 = vmax.f32 %v615_v53, 0.0  ;;  %v893_v62 = vmax.f32 %v743_v54, 0.0 }
 0x154   : > { %922 = vst [vmem:[%s1813_s10] sm:$0xff] %v858_v57  ;;  %954 = vst [vmem:[%s1813_s10 + $0x100] sm:$0xff] %v890_v58  ;;  %v859_v63 = vmax.f32 %v607_v59, 0.0  ;;  %v891_v0 = vmax.f32 %v735_v60, 0.0 }
 0x155   : > { %925 = vst [vmem:[%s1813_s10 + $0x18] sm:$0xff] %v861_v61  ;;  %957 = vst [vmem:[%s1813_s10 + $0x118] sm:$0xff] %v893_v62 }
 0x156   : > { %923 = vst [vmem:[%s1813_s10 + $0x8] sm:$0xff] %v859_v63  ;;  %955 = vst [vmem:[%s1813_s10 + $0x108] sm:$0xff] %v891_v0  ;;  %v1231_v1 = vpop.f32.mrb[4].mxu0  ;;  %v1263_v2 = vpop.f32.mrb[4].mxu1 }
 0x157   : > { %v628_v3 = vadd.f32 %v1231_v1, %v1802_v40  ;;  %v756_v4 = vadd.f32 %v1263_v2, %v1802_v40  ;;  %v619_v5 = vpop.f32.mrb[5].mxu0  ;;  %v747_v6 = vpop.f32.mrb[5].mxu1 }
 0x158   : > { %v620_v7 = vadd.f32 %v1802_v40, %v619_v5  ;;  %v748_v8 = vadd.f32 %v1802_v40, %v747_v6  ;;  %v1232_v9 = vpop.f32.mrb[6].mxu0  ;;  %v1264_v10 = vpop.f32.mrb[6].mxu1 }
 0x159   : > { %v864_v11 = vmax.f32 %v628_v3, 0.0  ;;  %v896_v12 = vmax.f32 %v756_v4, 0.0  ;;  %v631_v13 = vadd.f32 %v1232_v9, %v1802_v40  ;;  %v759_v14 = vadd.f32 %v1264_v10, %v1802_v40  ;;  %v622_v15 = vpop.f32.mrb[7].mxu0  ;;  %v750_v16 = vpop.f32.mrb[7].mxu1 }
 0x15a   : > { %v862_v17 = vmax.f32 %v620_v7, 0.0  ;;  %v894_v18 = vmax.f32 %v748_v8, 0.0  ;;  %v623_v19 = vadd.f32 %v1802_v40, %v622_v15  ;;  %v751_v20 = vadd.f32 %v1802_v40, %v750_v16 }
 0x15b   : > { %928 = vst [vmem:[%s1813_s10 + $0x30] sm:$0xff] %v864_v11  ;;  %960 = vst [vmem:[%s1813_s10 + $0x130] sm:$0xff] %v896_v12  ;;  %v865_v21 = vmax.f32 %v631_v13, 0.0  ;;  %v897_v22 = vmax.f32 %v759_v14, 0.0 }
 0x15c   : > { %926 = vst [vmem:[%s1813_s10 + $0x20] sm:$0xff] %v862_v17  ;;  %958 = vst [vmem:[%s1813_s10 + $0x120] sm:$0xff] %v894_v18  ;;  %v863_v23 = vmax.f32 %v623_v19, 0.0  ;;  %v895_v24 = vmax.f32 %v751_v20, 0.0 }
 0x15d   : > { %929 = vst [vmem:[%s1813_s10 + $0x38] sm:$0xff] %v865_v21  ;;  %961 = vst [vmem:[%s1813_s10 + $0x138] sm:$0xff] %v897_v22 }
 0x15e   : > { %927 = vst [vmem:[%s1813_s10 + $0x28] sm:$0xff] %v863_v23  ;;  %959 = vst [vmem:[%s1813_s10 + $0x128] sm:$0xff] %v895_v24  ;;  %v1235_v25 = vpop.f32.mrb[8].mxu0  ;;  %v1267_v26 = vpop.f32.mrb[8].mxu1 }
 0x15f   : > { %v644_v27 = vadd.f32 %v1235_v25, %v1802_v40  ;;  %v772_v28 = vadd.f32 %v1267_v26, %v1802_v40  ;;  %v635_v29 = vpop.f32.mrb[9].mxu0  ;;  %v763_v30 = vpop.f32.mrb[9].mxu1 }
 0x160   : > { %v636_v31 = vadd.f32 %v1802_v40, %v635_v29  ;;  %v764_v32 = vadd.f32 %v1802_v40, %v763_v30  ;;  %v1236_v33 = vpop.f32.mrb[10].mxu0  ;;  %v1268_v34 = vpop.f32.mrb[10].mxu1 }
 0x161   : > { %v868_v35 = vmax.f32 %v644_v27, 0.0  ;;  %v900_v36 = vmax.f32 %v772_v28, 0.0  ;;  %v647_v37 = vadd.f32 %v1236_v33, %v1802_v40  ;;  %v775_v38 = vadd.f32 %v1268_v34, %v1802_v40  ;;  %v638_v39 = vpop.f32.mrb[11].mxu0  ;;  %v766_v41 = vpop.f32.mrb[11].mxu1 }
 0x162   : > { %v866_v42 = vmax.f32 %v636_v31, 0.0  ;;  %v898_v43 = vmax.f32 %v764_v32, 0.0  ;;  %v639_v44 = vadd.f32 %v1802_v40, %v638_v39  ;;  %v767_v45 = vadd.f32 %v1802_v40, %v766_v41 }
 0x163   : > { %932 = vst [vmem:[%s1813_s10 + $0x50] sm:$0xff] %v868_v35  ;;  %964 = vst [vmem:[%s1813_s10 + $0x150] sm:$0xff] %v900_v36  ;;  %v869_v46 = vmax.f32 %v647_v37, 0.0  ;;  %v901_v47 = vmax.f32 %v775_v38, 0.0 }
 0x164   : > { %930 = vst [vmem:[%s1813_s10 + $0x40] sm:$0xff] %v866_v42  ;;  %962 = vst [vmem:[%s1813_s10 + $0x140] sm:$0xff] %v898_v43  ;;  %v867_v48 = vmax.f32 %v639_v44, 0.0  ;;  %v899_v49 = vmax.f32 %v767_v45, 0.0 }
 0x165   : > { %933 = vst [vmem:[%s1813_s10 + $0x58] sm:$0xff] %v869_v46  ;;  %965 = vst [vmem:[%s1813_s10 + $0x158] sm:$0xff] %v901_v47 }
 0x166   : > { %931 = vst [vmem:[%s1813_s10 + $0x48] sm:$0xff] %v867_v48  ;;  %963 = vst [vmem:[%s1813_s10 + $0x148] sm:$0xff] %v899_v49  ;;  %v1239_v50 = vpop.f32.mrb[12].mxu0  ;;  %v1271_v51 = vpop.f32.mrb[12].mxu1 }
 0x167   : > { %v660_v52 = vadd.f32 %v1239_v50, %v1802_v40  ;;  %v788_v53 = vadd.f32 %v1271_v51, %v1802_v40  ;;  %v651_v54 = vpop.f32.mrb[13].mxu0  ;;  %v779_v55 = vpop.f32.mrb[13].mxu1 }
 0x168   : > { %v652_v56 = vadd.f32 %v1802_v40, %v651_v54  ;;  %v780_v57 = vadd.f32 %v1802_v40, %v779_v55  ;;  %v1240_v58 = vpop.f32.mrb[14].mxu0  ;;  %v1272_v59 = vpop.f32.mrb[14].mxu1 }
 0x169   : > { %v872_v60 = vmax.f32 %v660_v52, 0.0  ;;  %v904_v61 = vmax.f32 %v788_v53, 0.0  ;;  %v663_v62 = vadd.f32 %v1240_v58, %v1802_v40  ;;  %v791_v63 = vadd.f32 %v1272_v59, %v1802_v40  ;;  %v654_v0 = vpop.f32.mrb[15].mxu0  ;;  %v782_v1 = vpop.f32.mrb[15].mxu1 }
 0x16a   : > { %v870_v2 = vmax.f32 %v652_v56, 0.0  ;;  %v902_v3 = vmax.f32 %v780_v57, 0.0  ;;  %v655_v4 = vadd.f32 %v1802_v40, %v654_v0  ;;  %v783_v5 = vadd.f32 %v1802_v40, %v782_v1 }
 0x16b   : > { %936 = vst [vmem:[%s1813_s10 + $0x70] sm:$0xff] %v872_v60  ;;  %968 = vst [vmem:[%s1813_s10 + $0x170] sm:$0xff] %v904_v61  ;;  %v873_v6 = vmax.f32 %v663_v62, 0.0  ;;  %v905_v7 = vmax.f32 %v791_v63, 0.0 }
 0x16c   : > { %934 = vst [vmem:[%s1813_s10 + $0x60] sm:$0xff] %v870_v2  ;;  %966 = vst [vmem:[%s1813_s10 + $0x160] sm:$0xff] %v902_v3  ;;  %v871_v8 = vmax.f32 %v655_v4, 0.0  ;;  %v903_v9 = vmax.f32 %v783_v5, 0.0 }
 0x16d   : > { %937 = vst [vmem:[%s1813_s10 + $0x78] sm:$0xff] %v873_v6  ;;  %969 = vst [vmem:[%s1813_s10 + $0x178] sm:$0xff] %v905_v7 }
 0x16e   : > { %935 = vst [vmem:[%s1813_s10 + $0x68] sm:$0xff] %v871_v8  ;;  %967 = vst [vmem:[%s1813_s10 + $0x168] sm:$0xff] %v903_v9  ;;  %v1243_v10 = vpop.f32.mrb[16].mxu0  ;;  %v1275_v11 = vpop.f32.mrb[16].mxu1 }
 0x16f   : > { %v676_v12 = vadd.f32 %v1243_v10, %v1802_v40  ;;  %v804_v13 = vadd.f32 %v1275_v11, %v1802_v40  ;;  %v667_v14 = vpop.f32.mrb[17].mxu0  ;;  %v795_v15 = vpop.f32.mrb[17].mxu1 }
 0x170   : > { %v668_v16 = vadd.f32 %v1802_v40, %v667_v14  ;;  %v796_v17 = vadd.f32 %v1802_v40, %v795_v15  ;;  %v1244_v18 = vpop.f32.mrb[18].mxu0  ;;  %v1276_v19 = vpop.f32.mrb[18].mxu1 }
 0x171   : > { %v876_v20 = vmax.f32 %v676_v12, 0.0  ;;  %v908_v21 = vmax.f32 %v804_v13, 0.0  ;;  %v679_v22 = vadd.f32 %v1244_v18, %v1802_v40  ;;  %v807_v23 = vadd.f32 %v1276_v19, %v1802_v40  ;;  %v670_v24 = vpop.f32.mrb[19].mxu0  ;;  %v798_v25 = vpop.f32.mrb[19].mxu1 }
 0x172   : > { %v874_v26 = vmax.f32 %v668_v16, 0.0  ;;  %v906_v27 = vmax.f32 %v796_v17, 0.0  ;;  %v671_v28 = vadd.f32 %v1802_v40, %v670_v24  ;;  %v799_v29 = vadd.f32 %v1802_v40, %v798_v25 }
 0x173   : > { %940 = vst [vmem:[%s1813_s10 + $0x90] sm:$0xff] %v876_v20  ;;  %972 = vst [vmem:[%s1813_s10 + $0x190] sm:$0xff] %v908_v21  ;;  %v877_v30 = vmax.f32 %v679_v22, 0.0  ;;  %v909_v31 = vmax.f32 %v807_v23, 0.0 }
 0x174   : > { %938 = vst [vmem:[%s1813_s10 + $0x80] sm:$0xff] %v874_v26  ;;  %970 = vst [vmem:[%s1813_s10 + $0x180] sm:$0xff] %v906_v27  ;;  %v875_v32 = vmax.f32 %v671_v28, 0.0  ;;  %v907_v33 = vmax.f32 %v799_v29, 0.0 }
 0x175   : > { %941 = vst [vmem:[%s1813_s10 + $0x98] sm:$0xff] %v877_v30  ;;  %973 = vst [vmem:[%s1813_s10 + $0x198] sm:$0xff] %v909_v31 }
 0x176   : > { %939 = vst [vmem:[%s1813_s10 + $0x88] sm:$0xff] %v875_v32  ;;  %971 = vst [vmem:[%s1813_s10 + $0x188] sm:$0xff] %v907_v33  ;;  %v1247_v34 = vpop.f32.mrb[20].mxu0  ;;  %v1279_v35 = vpop.f32.mrb[20].mxu1 }
 0x177   : > { %v692_v36 = vadd.f32 %v1247_v34, %v1802_v40  ;;  %v820_v37 = vadd.f32 %v1279_v35, %v1802_v40  ;;  %v683_v38 = vpop.f32.mrb[21].mxu0  ;;  %v811_v39 = vpop.f32.mrb[21].mxu1 }
 0x178   : > { %v684_v41 = vadd.f32 %v1802_v40, %v683_v38  ;;  %v812_v42 = vadd.f32 %v1802_v40, %v811_v39  ;;  %v1248_v43 = vpop.f32.mrb[22].mxu0  ;;  %v1280_v44 = vpop.f32.mrb[22].mxu1 }
 0x179   : > { %v880_v45 = vmax.f32 %v692_v36, 0.0  ;;  %v912_v46 = vmax.f32 %v820_v37, 0.0  ;;  %v695_v47 = vadd.f32 %v1248_v43, %v1802_v40  ;;  %v823_v48 = vadd.f32 %v1280_v44, %v1802_v40  ;;  %v686_v49 = vpop.f32.mrb[23].mxu0  ;;  %v814_v50 = vpop.f32.mrb[23].mxu1 }
 0x17a   : > { %v878_v51 = vmax.f32 %v684_v41, 0.0  ;;  %v910_v52 = vmax.f32 %v812_v42, 0.0  ;;  %v687_v53 = vadd.f32 %v1802_v40, %v686_v49  ;;  %v815_v54 = vadd.f32 %v1802_v40, %v814_v50 }
 0x17b   : > { %944 = vst [vmem:[%s1813_s10 + $0xb0] sm:$0xff] %v880_v45  ;;  %976 = vst [vmem:[%s1813_s10 + $0x1b0] sm:$0xff] %v912_v46  ;;  %v881_v55 = vmax.f32 %v695_v47, 0.0  ;;  %v913_v56 = vmax.f32 %v823_v48, 0.0 }
 0x17c   : > { %942 = vst [vmem:[%s1813_s10 + $0xa0] sm:$0xff] %v878_v51  ;;  %974 = vst [vmem:[%s1813_s10 + $0x1a0] sm:$0xff] %v910_v52  ;;  %v879_v57 = vmax.f32 %v687_v53, 0.0  ;;  %v911_v58 = vmax.f32 %v815_v54, 0.0 }
 0x17d   : > { %945 = vst [vmem:[%s1813_s10 + $0xb8] sm:$0xff] %v881_v55  ;;  %977 = vst [vmem:[%s1813_s10 + $0x1b8] sm:$0xff] %v913_v56 }
 0x17e   : > { %943 = vst [vmem:[%s1813_s10 + $0xa8] sm:$0xff] %v879_v57  ;;  %975 = vst [vmem:[%s1813_s10 + $0x1a8] sm:$0xff] %v911_v58  ;;  %v1251_v59 = vpop.f32.mrb[24].mxu0  ;;  %v1283_v60 = vpop.f32.mrb[24].mxu1 }
 0x17f   : > { %v708_v61 = vadd.f32 %v1251_v59, %v1802_v40  ;;  %v836_v62 = vadd.f32 %v1283_v60, %v1802_v40  ;;  %v699_v63 = vpop.f32.mrb[25].mxu0  ;;  %v827_v0 = vpop.f32.mrb[25].mxu1 }
 0x180   : > { %v700_v1 = vadd.f32 %v1802_v40, %v699_v63  ;;  %v828_v2 = vadd.f32 %v1802_v40, %v827_v0  ;;  %v1252_v3 = vpop.f32.mrb[26].mxu0  ;;  %v1284_v4 = vpop.f32.mrb[26].mxu1 }
 0x181   : > { %v884_v5 = vmax.f32 %v708_v61, 0.0  ;;  %v916_v6 = vmax.f32 %v836_v62, 0.0  ;;  %v711_v7 = vadd.f32 %v1252_v3, %v1802_v40  ;;  %v839_v8 = vadd.f32 %v1284_v4, %v1802_v40  ;;  %v702_v9 = vpop.f32.mrb[27].mxu0  ;;  %v830_v10 = vpop.f32.mrb[27].mxu1 }
 0x182   : > { %v882_v11 = vmax.f32 %v700_v1, 0.0  ;;  %v914_v12 = vmax.f32 %v828_v2, 0.0  ;;  %v703_v13 = vadd.f32 %v1802_v40, %v702_v9  ;;  %v831_v14 = vadd.f32 %v1802_v40, %v830_v10 }
 0x183   : > { %948 = vst [vmem:[%s1813_s10 + $0xd0] sm:$0xff] %v884_v5  ;;  %980 = vst [vmem:[%s1813_s10 + $0x1d0] sm:$0xff] %v916_v6  ;;  %v885_v15 = vmax.f32 %v711_v7, 0.0  ;;  %v917_v16 = vmax.f32 %v839_v8, 0.0 }
 0x184   : > { %946 = vst [vmem:[%s1813_s10 + $0xc0] sm:$0xff] %v882_v11  ;;  %978 = vst [vmem:[%s1813_s10 + $0x1c0] sm:$0xff] %v914_v12  ;;  %v883_v17 = vmax.f32 %v703_v13, 0.0  ;;  %v915_v18 = vmax.f32 %v831_v14, 0.0 }
 0x185   : > { %949 = vst [vmem:[%s1813_s10 + $0xd8] sm:$0xff] %v885_v15  ;;  %981 = vst [vmem:[%s1813_s10 + $0x1d8] sm:$0xff] %v917_v16 }
 0x186   : > { %947 = vst [vmem:[%s1813_s10 + $0xc8] sm:$0xff] %v883_v17  ;;  %979 = vst [vmem:[%s1813_s10 + $0x1c8] sm:$0xff] %v915_v18  ;;  %v1255_v19 = vpop.f32.mrb[28].mxu0  ;;  %v1287_v20 = vpop.f32.mrb[28].mxu1 }
 0x187   : > { %v724_v21 = vadd.f32 %v1255_v19, %v1802_v40  ;;  %v852_v22 = vadd.f32 %v1287_v20, %v1802_v40  ;;  %v715_v23 = vpop.f32.mrb[29].mxu0  ;;  %v843_v24 = vpop.f32.mrb[29].mxu1 }
 0x188   : > { %v716_v25 = vadd.f32 %v1802_v40, %v715_v23  ;;  %v844_v26 = vadd.f32 %v1802_v40, %v843_v24  ;;  %v1256_v27 = vpop.f32.mrb[30].mxu0  ;;  %v1288_v28 = vpop.f32.mrb[30].mxu1 }
 0x189   : > { %v888_v29 = vmax.f32 %v724_v21, 0.0  ;;  %v920_v30 = vmax.f32 %v852_v22, 0.0  ;;  %v727_v31 = vadd.f32 %v1256_v27, %v1802_v40  ;;  %v855_v32 = vadd.f32 %v1288_v28, %v1802_v40  ;;  %v718_v33 = vpop.f32.mrb[31].mxu0  ;;  %v846_v34 = vpop.f32.mrb[31].mxu1 }
 0x18a   : > { %v886_v35 = vmax.f32 %v716_v25, 0.0  ;;  %v918_v36 = vmax.f32 %v844_v26, 0.0  ;;  %v719_v37 = vadd.f32 %v1802_v40, %v718_v33  ;;  %v847_v38 = vadd.f32 %v1802_v40, %v846_v34 }
 0x18b   : > { %952 = vst [vmem:[%s1813_s10 + $0xf0] sm:$0xff] %v888_v29  ;;  %984 = vst [vmem:[%s1813_s10 + $0x1f0] sm:$0xff] %v920_v30  ;;  %v889_v39 = vmax.f32 %v727_v31, 0.0  ;;  %v921_v41 = vmax.f32 %v855_v32, 0.0 }
 0x18c   : > { %950 = vst [vmem:[%s1813_s10 + $0xe0] sm:$0xff] %v886_v35  ;;  %982 = vst [vmem:[%s1813_s10 + $0x1e0] sm:$0xff] %v918_v36  ;;  %v887_v42 = vmax.f32 %v719_v37, 0.0  ;;  %v919_v43 = vmax.f32 %v847_v38, 0.0 }
 0x18d   : > { %953 = vst [vmem:[%s1813_s10 + $0xf8] sm:$0xff] %v889_v39  ;;  %985 = vst [vmem:[%s1813_s10 + $0x1f8] sm:$0xff] %v921_v41 }
 0x18e   : > { %951 = vst [vmem:[%s1813_s10 + $0xe8] sm:$0xff] %v887_v42  ;;  %983 = vst [vmem:[%s1813_s10 + $0x1e8] sm:$0xff] %v919_v43 }
 0x18f   : > { %1493 = shalt.err (!%p1490_p5)
}
 0x190   : > { %s1494_s29 = scalar_lea.hbm %s1934_s19, 8192  ;;  %s1498_s20 = scalar_lea.hbm %s1994_s3, 16384 }
 0x191   : > { %p1495_p9 = scmp.ne.s32.totalorder %s1934_s19, %s1494_s29  ;;  %p1499_p3 = scmp.lt.u32.totalorder %s1934_s19, %s1994_s3 }
 0x192   : > { %p1500_p7 = scmp.lt.u32.totalorder %s1498_s20, %s1494_s29  ;;  %p1502_p4 = scmp.lt.u32.totalorder %s1494_s29, %s1934_s19 }
 0x193   : > { %p1496_p1 = pnand %p1495_p9, %p1694_p10 }
 0x194   : > { %p1501_p13 = por %p1500_p7, %p1499_p3 }
 0x195   : > { %p1497_p2 = pneg %p1496_p1 }
 0x196   : > { %p1503_p6 = por %p1502_p4, %p1501_p13 }
 0x198   : > { %p1504_p8 = pnand %p1503_p6, %p1497_p2 }
 0x19a   : > { %1507 = shalt.err (!%p1504_p8)
}
 0x19b   : > { %s1573_s10 = smov 128   ;;  %s1574_s11 = smov 8  }
 0x19c   : > { %1311 = dma.vmem_to_hbm [thread:$0]  (%p1694_p10), %s1936_s9, 8192, %s1934_s19, %s987_s25, %s1573_s10, %s1573_s10, %s1574_s11  }
 0x19d PF: > { %s1016_s15 = sand.u32 1, %s1546_s12   ;;  %p2012_p12 = scmp.ne.s32.totalorder %s2002_s23, 0 }
 0x19e   : > { %p2013_p11 = scmp.ge.s32.totalorder %s1566_s17, 2  ;;  %s1017_s18 = scalar_lea.sflag [#allocation4], %s1016_s15 }
 0x1a0   : > { %p1322_p0 = pnand %p2013_p11, %p2012_p12 }
 0x1a2   : > { %1541 = dma.done.wait (!%p1322_p0), %s1017_s18, 8192  }
 0x1a3   : > { %1543 = vsyncadd (!%p1322_p0), %s1017_s18, 4294959104  ;;  %s20_s17 = sadd.s32 1, %s1566_s17   ;;  %s2014_s12 = smov %s1550_s13 }
 0x1a4   : > { %p17_p5 = scmp.ge.s32.totalorder %s20_s17, 4   ;;  %s2015_s13 = smov %s1554_s14 }
 0x1a5   : > { %s2016_s14 = smov %s1703_s5  ;;  %s2017_s15 = smov %s1562_s16 }
 0x1a6   : > { %s2018_s16 = smov %s2020_s28  ;;  %19 = sbr.rel (!%p17_p5) target bundleno = 7 (0x7), region = 85 }
 0x1ad   :  { %1022 = vsyncpa [#allocation3], 1 }
 0x1ae   :  { %1024 = vsyncpa [#allocation3 + $0x1], 1 }
 0x1af   :  { %1025 = vsyncpa [#allocation6], 1 }
 0x1b0   :  { %1026 = vsyncpa [#allocation4], 1 }
 0x1b1   :  { %1028 = vsyncpa [#allocation4 + $0x1], 1 }

</bundles_post_ra>
